<compile_context>
chip_gen: v7x
topology: tpu7x:2x2x1
jax: 0.10.0
libtpu: 0.0.40
codegen_flags: <defaults>
</compile_context>

<pallas_src>
import functools

import jax
import jax.numpy as jnp
from jax.experimental import pallas as pl
from jax.experimental.pallas import tpu as pltpu


def _automasked_bce_kernel(pred_ref, gold_ref, loss_sum_ref, mask_sum_ref,
                           *, mode, maskid, trueid):
    x = pred_ref[...].astype(jnp.float32)            # (TB, T_pad)
    g = gold_ref[...]                                # (TB, T_pad) int32

    mask = (g != maskid).astype(jnp.float32)
    y = (g == trueid).astype(jnp.float32)

    if mode == "logits":
        # numerically stable BCE-with-logits: max(x,0) - x*y + log(1 + exp(-|x|))
        l = jnp.maximum(x, 0.0) - x * y + jnp.log(1.0 + jnp.exp(-jnp.abs(x)))
    elif mode == "probs":
        # torch.nn.BCELoss clamps each log term at -100
        log_p = jnp.maximum(jnp.log(x), -100.0)
        log_1mp = jnp.maximum(jnp.log(1.0 - x), -100.0)
        l = -(y * log_p + (1.0 - y) * log_1mp)
    else:
        raise ValueError(f"unknown mode: {mode}")

    l = l * mask

    # lane-dense (1, 128) partial-sum blocks (unmasked vst), one per grid step
    loss_sum_ref[...] = jnp.full((1, 128), jnp.sum(l), dtype=jnp.float32)
    mask_sum_ref[...] = jnp.full((1, 128), jnp.sum(mask), dtype=jnp.float32)


def _round_up(x, m):
    return (x + m - 1) // m * m


def automasked_bce_loss(pred, gold, *, mode="logits", reduction="mean",
                        maskid=0, trueid=2):
    """Pallas implementation of AutomaskedBCELoss.forward (weight/pos_weight=None)."""
    # TODO(synk): weight / pos_weight tensors and reduction='none' are not wired up.
    if reduction not in ("mean", "sum"):
        raise NotImplementedError("only 'mean' and 'sum' reductions are wired up")

    assert pred.shape == gold.shape and pred.ndim == 2
    B, T = pred.shape
    gold = gold.astype(jnp.int32)

    # Pad to layout-friendly shapes. Padded gold == maskid => mask == 0 there,
    # so padding contributes 0 to both sums and the result stays exact.
    T_pad = _round_up(T, 128)
    itemsize = pred.dtype.itemsize
    bytes_per_row = T_pad * (itemsize + 4)            # one pred row + one gold row
    max_block_bytes = 4 * 1024 * 1024                 # safe, double-buffered, all gens
    tb_cap = max(8, (max_block_bytes // bytes_per_row) // 8 * 8)
    TB = min(_round_up(B, 8), tb_cap, 1024)
    B_pad = _round_up(B, TB)
    num_blocks = B_pad // TB

    pred_p = jnp.pad(pred, ((0, B_pad - B), (0, T_pad - T)))
    gold_p = jnp.pad(gold, ((0, B_pad - B), (0, T_pad - T)),
                     constant_values=maskid)

    kernel = functools.partial(_automasked_bce_kernel, mode=mode,
                               maskid=maskid, trueid=trueid)

    loss_parts, mask_parts = pl.pallas_call(
        kernel,
        out_shape=(jax.ShapeDtypeStruct((num_blocks, 128), jnp.float32),
                   jax.ShapeDtypeStruct((num_blocks, 128), jnp.float32)),
        grid_spec=pltpu.PrefetchScalarGridSpec(
            num_scalar_prefetch=0,
            grid=(num_blocks,),
            in_specs=[pl.BlockSpec((TB, T_pad), lambda i: (i, 0)),
                      pl.BlockSpec((TB, T_pad), lambda i: (i, 0))],
            out_specs=[pl.BlockSpec((1, 128), lambda i: (i, 0)),
                       pl.BlockSpec((1, 128), lambda i: (i, 0))],
        ),
        compiler_params=pltpu.CompilerParams(
            dimension_semantics=("parallel",),
            vmem_limit_bytes=32 * 1024 * 1024,
        ),
    )(pred_p, gold_p)

    total_loss = jnp.sum(loss_parts[:, 0])
    if reduction == "sum":
        return total_loss
    total_mask = jnp.sum(mask_parts[:, 0])
    # l.mean() * (numel / mask.sum())  ==  sum(l * mask) / mask.sum()
    return total_loss / total_mask


def _reference(pred, gold, *, maskid=0, trueid=2, reduction="mean"):
    # pure-JAX mirror of the PyTorch code (mode='logits'), for a sanity check
    x = pred.astype(jnp.float32)
    mask = (gold != maskid).astype(jnp.float32)
    y = (gold == trueid).astype(jnp.float32)
    l = jnp.maximum(x, 0.0) - x * y + jnp.log1p(jnp.exp(-jnp.abs(x)))
    l = l * mask
    if reduction == "sum":
        return jnp.sum(l)
    return jnp.mean(l) * (l.size / jnp.sum(mask))


if __name__ == "__main__":
    B, T = 4, 10                   # small shapes; wrapper pads up to (8, 128) tiles
    key = jax.random.PRNGKey(0)
    k_pred, k_gold = jax.random.split(key)

    pred = jax.random.normal(k_pred, (B, T), dtype=jnp.float32)
    # gold labels in {0 (mask), 1 (false), 2 (true)}
    gold = jax.random.randint(k_gold, (B, T), 0, 3, dtype=jnp.int32)
    gold = gold.at[0, 0].set(2)    # ensure at least one unmasked position

    out_mean = automasked_bce_loss(pred, gold, reduction="mean")
    out_sum = automasked_bce_loss(pred, gold, reduction="sum")
    jax.block_until_ready((out_mean, out_sum))

    ref_mean = _reference(pred, gold, reduction="mean")
    ref_sum = _reference(pred, gold, reduction="sum")
    assert jnp.allclose(out_mean, ref_mean, atol=1e-5, rtol=1e-5), (out_mean, ref_mean)
    assert jnp.allclose(out_sum, ref_sum, atol=1e-5, rtol=1e-5), (out_sum, ref_sum)

    print("KERNEL_OK")
</pallas_src>

<mosaic_0001>
module attributes {stable_mosaic.version = 11 : i64} {
  func.func @_automasked_bce_kernel(%arg0: i32, %arg1: memref<8x128xf32, #tpu.memory_space<vmem>>, %arg2: memref<8x128xi32, #tpu.memory_space<vmem>>, %arg3: memref<1x128xf32, #tpu.memory_space<vmem>>, %arg4: memref<1x128xf32, #tpu.memory_space<vmem>>) attributes {dimension_semantics = [#tpu.dimension_semantics<parallel>], iteration_bounds = array<i64: 1>, scalar_prefetch = 0 : i64, scratch_operands = 0 : i64, tpu.core_type = #tpu.core_type<tc>, window_params = [{transform_indices = @transform_0, window_bounds = array<i64: 8, 128>}, {transform_indices = @transform_1, window_bounds = array<i64: 8, 128>}, {transform_indices = @transform_2, window_bounds = array<i64: 1, 128>}, {transform_indices = @transform_3, window_bounds = array<i64: 1, 128>}]} {
    %c0 = arith.constant 0 : index
    %c0_0 = arith.constant 0 : index
    %0 = vector.load %arg1[%c0, %c0_0] : memref<8x128xf32, #tpu.memory_space<vmem>>, vector<8x128xf32>
    %c0_1 = arith.constant 0 : index
    %c0_2 = arith.constant 0 : index
    %1 = vector.load %arg2[%c0_1, %c0_2] : memref<8x128xi32, #tpu.memory_space<vmem>>, vector<8x128xi32>
    %c0_i32 = arith.constant 0 : i32
    %2 = vector.broadcast %c0_i32 : i32 to vector<8x128xi32>
    %3 = arith.cmpi ne, %1, %2 : vector<8x128xi32>
    %4 = arith.extui %3 : vector<8x128xi1> to vector<8x128xi32>
    %5 = arith.sitofp %4 : vector<8x128xi32> to vector<8x128xf32>
    %c2_i32 = arith.constant 2 : i32
    %6 = vector.broadcast %c2_i32 : i32 to vector<8x128xi32>
    %7 = arith.cmpi eq, %1, %6 : vector<8x128xi32>
    %8 = arith.extui %7 : vector<8x128xi1> to vector<8x128xi32>
    %9 = arith.sitofp %8 : vector<8x128xi32> to vector<8x128xf32>
    %cst = arith.constant 0.000000e+00 : f32
    %10 = vector.broadcast %cst : f32 to vector<8x128xf32>
    %11 = arith.maximumf %0, %10 : vector<8x128xf32>
    %12 = arith.mulf %0, %9 : vector<8x128xf32>
    %13 = arith.subf %11, %12 : vector<8x128xf32>
    %14 = math.absf %0 : vector<8x128xf32>
    %cst_3 = arith.constant 0.000000e+00 : f32
    %15 = vector.broadcast %cst_3 : f32 to vector<8x128xf32>
    %16 = arith.subf %15, %14 : vector<8x128xf32>
    %17 = math.exp %16 : vector<8x128xf32>
    %cst_4 = arith.constant 1.000000e+00 : f32
    %18 = vector.broadcast %cst_4 : f32 to vector<8x128xf32>
    %19 = arith.addf %18, %17 : vector<8x128xf32>
    %20 = math.log %19 : vector<8x128xf32>
    %21 = arith.addf %13, %20 : vector<8x128xf32>
    %22 = arith.mulf %21, %5 : vector<8x128xf32>
    %23 = vector.shape_cast %22 : vector<8x128xf32> to vector<1x8x128xf32>
    %cst_5 = arith.constant dense<0.000000e+00> : vector<1xf32>
    %24 = vector.multi_reduction <add>, %23, %cst_5 [1, 2] : vector<1x8x128xf32> to vector<1xf32>
    %25 = vector.shape_cast %24 : vector<1xf32> to vector<1x1x1xf32>
    %26 = vector.extract %25[0, 0, 0] : f32 from vector<1x1x1xf32>
    %27 = vector.broadcast %26 : f32 to vector<1x128xf32>
    %c0_6 = arith.constant 0 : index
    %c0_7 = arith.constant 0 : index
    %28 = vector.load %arg3[%c0_6, %c0_7] : memref<1x128xf32, #tpu.memory_space<vmem>>, vector<1x128xf32>
    tpu.vector_store %arg3[%c0_6, %c0_7], %27 {strides = array<i32>} : memref<1x128xf32, #tpu.memory_space<vmem>>, vector<1x128xf32>,
    %29 = vector.shape_cast %5 : vector<8x128xf32> to vector<1x8x128xf32>
    %cst_8 = arith.constant dense<0.000000e+00> : vector<1xf32>
    %30 = vector.multi_reduction <add>, %29, %cst_8 [1, 2] : vector<1x8x128xf32> to vector<1xf32>
    %31 = vector.shape_cast %30 : vector<1xf32> to vector<1x1x1xf32>
    %32 = vector.extract %31[0, 0, 0] : f32 from vector<1x1x1xf32>
    %33 = vector.broadcast %32 : f32 to vector<1x128xf32>
    %c0_9 = arith.constant 0 : index
    %c0_10 = arith.constant 0 : index
    %34 = vector.load %arg4[%c0_9, %c0_10] : memref<1x128xf32, #tpu.memory_space<vmem>>, vector<1x128xf32>
    tpu.vector_store %arg4[%c0_9, %c0_10], %33 {strides = array<i32>} : memref<1x128xf32, #tpu.memory_space<vmem>>, vector<1x128xf32>,
    return
  }
  func.func @transform_0(%arg0: i32) -> (i32, i32) {
    %c0_i32 = arith.constant 0 : i32
    %c0_i32_0 = arith.constant 0 : i32
    return %arg0, %c0_i32 : i32, i32
  }
  func.func @transform_1(%arg0: i32) -> (i32, i32) {
    %c0_i32 = arith.constant 0 : i32
    %c0_i32_0 = arith.constant 0 : i32
    return %arg0, %c0_i32 : i32, i32
  }
  func.func @transform_2(%arg0: i32) -> (i32, i32) {
    %c0_i32 = arith.constant 0 : i32
    %c0_i32_0 = arith.constant 0 : i32
    return %arg0, %c0_i32 : i32, i32
  }
  func.func @transform_3(%arg0: i32) -> (i32, i32) {
    %c0_i32 = arith.constant 0 : i32
    %c0_i32_0 = arith.constant 0 : i32
    return %arg0, %c0_i32 : i32, i32
  }
}

</mosaic_0001>

<bundles_post_ra>
// kernel: tpu_custom_call.1
= control target key start
LH: loop header
LB: loop body
LE: loop exit
PB: predicated region body
PF: predicated region fallthrough
CT: control target
= control target key end

     0   :  { %9 = vsyncpa [#allocation3], 0  ;;  %s295_s0 = inlined_call_operand.hbm [shape: f32[8,128], index: 0, kind: input, shape index: {}]   ;;  %s296_s1 = inlined_call_operand.hbm [shape: s32[8,128], index: 1, kind: input, shape index: {}]   ;;  %s297_s2 = inlined_call_operand.hbm [shape: f32[1,128], index: 2, kind: output, shape index: {0}]   ;;  %s298_s3 = inlined_call_operand.hbm [shape: f32[1,128], index: 3, kind: output, shape index: {1}]  }
   0x1   :  { %10 = vsyncpa [#allocation6], 0 }
   0x2   :  { %11 = vsyncpa [#allocation4], 0 }
   0x3   :  { %12 = vsyncpa [#allocation9], 0  ;;  %s222_s12 = smov [#allocation2]   ;;  %s223_s14 = smov [#allocation5]  }
   0x4   :  { %s19_s13 = sshll.u32 %s222_s12, 4  ;;  %s29_s15 = sshll.u32 %s223_s14, 4  ;;  %s20_s13 = int_to_ptr.vmem [resolvable:$true] %s19_s13  ;;  %s30_s15 = int_to_ptr.vmem [resolvable:$true] %s29_s15 }
   0x5   :  { %s126_s18 = scalar_lea.hbm %s295_s0, 128 }
   0x6   :  { %p127_p0 = scmp.ne.s32.totalorder %s295_s0, %s126_s18  ;;  %p130_p1 = scmp.lt.u32.totalorder %s126_s18, %s295_s0 }
   0x8   :  { %p132_p2 = pnand %p130_p1, %p127_p0 }
   0xa   :  { %135 = shalt.err (!%p132_p2)
}
   0xb   :  { %s136_s23 = scalar_lea.vmem %s20_s13, 128  ;;  %p141_p4 = scmp.lt.s32.totalorder %s20_s13, %s20_s13 }
   0xc   :  { %p137_p3 = scmp.ne.s32.totalorder %s20_s13, %s136_s23  ;;  %p142_p5 = scmp.lt.s32.totalorder %s136_s23, %s136_s23 }
   0xe   :  { %p143_p6 = por %p142_p5, %p141_p4 }
  0x10   :  { %p144_p7 = pnand %p143_p6, %p137_p3 }
  0x12   :  { %147 = shalt.err (!%p144_p7)
}
  0x13   :  { %22 = dma.hbm_to_vmem [thread:$0]  %s295_s0, 128, %s20_s13, [#allocation3]  }
  0x14   :  { %s148_s28 = scalar_lea.hbm %s296_s1, 128 }
  0x15   :  { %p149_p8 = scmp.ne.s32.totalorder %s296_s1, %s148_s28  ;;  %p152_p9 = scmp.lt.u32.totalorder %s148_s28, %s296_s1 }
  0x17   :  { %p154_p10 = pnand %p152_p9, %p149_p8 }
  0x19   :  { %157 = shalt.err (!%p154_p10)
}
  0x1a   :  { %s158_s6 = scalar_lea.vmem %s30_s15, 128  ;;  %p163_p12 = scmp.lt.s32.totalorder %s30_s15, %s30_s15 }
  0x1b   :  { %p159_p11 = scmp.ne.s32.totalorder %s30_s15, %s158_s6  ;;  %p164_p13 = scmp.lt.s32.totalorder %s158_s6, %s158_s6 }
  0x1d   :  { %p165_p0 = por %p164_p13, %p163_p12 }
  0x1f   :  { %p166_p1 = pnand %p165_p0, %p159_p11 }
  0x21   :  { %169 = shalt.err (!%p166_p1)
}
  0x22   :  { %32 = dma.hbm_to_vmem [thread:$0]  %s296_s1, 128, %s30_s15, [#allocation6]  }
  0x23   :  { %214 = dma.done.wait [#allocation3], 128  }
  0x24   :  { %215 = vsyncadd [#allocation3], 4294967168 }
  0x25   :  { %216 = dma.done.wait [#allocation6], 128  }
  0x26   :  { %217 = vsyncadd [#allocation6], 4294967168  ;;  %v39_v0 = vld [vmem:[#allocation2] sm:$0xff]  ;;  %v40_v4 = vld [vmem:[#allocation5] sm:$0xff]  ;;  %v224_v7 = vmov 0.0   ;;  %s225_s1 = smov [#allocation7]  }
  0x27   :  { %v50_v1 = vand.u32 2147483647, %v39_v0  ;;  %vm44_vm0 = vcmp.eq.s32.totalorder %v40_v4, 2  ;;  %v47_v9 = vmax.f32 %v39_v0, 0.0  ;;  %vm41_vm1 = vcmp.ne.s32.totalorder %v40_v4, 0  ;;  %s87_s8 = sshll.u32 %s225_s1, 4  ;;  %s88_s8 = int_to_ptr.vmem [resolvable:$true] %s87_s8 }
  0x28   :  { %v112_v8 = vsel %vm44_vm0, 1.0, %v224_v7  ;;  %v111_v14 = vsel %vm41_vm1, 1.0, %v224_v7  ;;  %s226_s10 = smov [#allocation8]   ;;  %s170_s12 = scalar_lea.vmem %s88_s8, 16 }
  0x29   :  { %v51_v2 = vsub.f32 0.0, %v50_v1  ;;  %v48_v10 = vmul.f32 %v112_v8, %v39_v0  ;;  %s97_s11 = sshll.u32 %s226_s10, 4  ;;  %p171_p2 = scmp.ne.s32.totalorder %s88_s8, %s170_s12  ;;  %s98_s11 = int_to_ptr.vmem [resolvable:$true] %s97_s11 }
  0x2a   :  { %s174_s13 = scalar_lea.vmem %s88_s8, 32  ;;  %p175_p3 = scmp.lt.s32.totalorder %s88_s8, %s88_s8 }
  0x2b   :  { %v52_v3 = vmul.f32 1.442695, %v51_v2  ;;  %v49_v11 = vsub.f32 %v47_v9, %v48_v10  ;;  %p176_p4 = scmp.lt.s32.totalorder %s174_s13, %s170_s12 }
  0x2d   :  { %122 = vpow2.f32 %v52_v3  ;;  %p177_p5 = por %p176_p4, %p175_p3 }
  0x2f   :  { %p178_p6 = pnand %p177_p5, %p171_p2 }
  0x37   :  { %v123_v5 = vpop.eup %122 }
  0x38   :  { %v54_v6 = vadd.f32 1.0, %v123_v5 }
  0x3a   :  { %124 = vlog2.f32 %v54_v6 }
  0x44   :  { %v125_v12 = vpop.eup %124 }
  0x45   :  { %v56_v13 = vmul.f32 0.6931472, %v125_v12 }
  0x47   :  { %v57_v15 = vadd.f32 %v56_v13, %v49_v11 }
  0x49   :  { %v58_v16 = vmul.f32 %v111_v14, %v57_v15 }
  0x4b   :  { %59 = vadd.xlane.f32.xlu0 %v58_v16 }
  0x4f   :  { %70 = vadd.xlane.f32.xlu0 %v111_v14 }
  0xd8   :  { %v60_v17 = vpop.xlane.xlu0 %59 }
  0xd9   :  { %v61_v18 = vrot.slane %v60_v17, 4 }
  0xdb   :  { %v62_v19 = vadd.f32 %v61_v18, %v60_v17 }
  0xdc   :  { %v71_v20 = vpop.xlane.xlu0 %70 }
  0xdd   :  { %v63_v21 = vrot.slane %v62_v19, 2  ;;  %v72_v22 = vrot.slane %v71_v20, 4 }
  0xdf   :  { %v73_v23 = vadd.f32 %v72_v22, %v71_v20  ;;  %v64_v24 = vadd.f32 %v63_v21, %v62_v19 }
  0xe1   :  { %v74_v25 = vrot.slane %v73_v23, 2  ;;  %v65_v26 = vrot.slane %v64_v24, 1 }
  0xe3   :  { %v75_v27 = vadd.f32 %v74_v25, %v73_v23  ;;  %v66_v28 = vadd.f32 %v65_v26, %v64_v24 }
  0xe5   :  { %113 = vpush %v66_v28  ;;  %v76_v29 = vrot.slane %v75_v27, 1 }
  0xe7   :  { %v77_v30 = vadd.f32 %v76_v29, %v75_v27 }
  0xe9   :  { %115 = vpush %v77_v30 }
 0x116   :  { %s114_s9 = spop %113 }
 0x117   :  { %v68_v31 = vstv %s114_s9 }
 0x118   :  { %69 = vst [vmem:[#allocation7] sm:$0x1] %v68_v31 }
 0x119   :  { %181 = shalt.err (!%p178_p6)
}
 0x11a   :  { %s182_s16 = scalar_lea.hbm %s297_s2, 16 }
 0x11b   :  { %p183_p7 = scmp.ne.s32.totalorder %s297_s2, %s182_s16  ;;  %p186_p8 = scmp.lt.u32.totalorder %s182_s16, %s297_s2 }
 0x11d   :  { %p188_p9 = pnand %p186_p8, %p183_p7 }
 0x11f   :  { %191 = shalt.err (!%p188_p9)
}
 0x120   :  { %90 = dma.vmem_to_hbm [thread:$0]  %s88_s8, 16, %s297_s2, [#allocation4]  }
 0x121   :  { %s116_s23 = spop %115  ;;  %s192_s24 = scalar_lea.vmem %s98_s11, 16 }
 0x122   :  { %v79_v32 = vstv %s116_s23  ;;  %p193_p10 = scmp.ne.s32.totalorder %s98_s11, %s192_s24  ;;  %s196_s25 = scalar_lea.vmem %s98_s11, 32 }
 0x123   :  { %80 = vst [vmem:[#allocation8] sm:$0x1] %v79_v32  ;;  %p197_p11 = scmp.lt.s32.totalorder %s98_s11, %s98_s11  ;;  %p198_p12 = scmp.lt.s32.totalorder %s196_s25, %s192_s24 }
 0x125   :  { %p199_p13 = por %p198_p12, %p197_p11 }
 0x127   :  { %p200_p0 = pnand %p199_p13, %p193_p10 }
 0x129   :  { %203 = shalt.err (!%p200_p0)
}
 0x12a   :  { %s204_s28 = scalar_lea.hbm %s298_s3, 16 }
 0x12b   :  { %p205_p1 = scmp.ne.s32.totalorder %s298_s3, %s204_s28  ;;  %p208_p2 = scmp.lt.u32.totalorder %s204_s28, %s298_s3 }
 0x12d   :  { %p210_p3 = pnand %p208_p2, %p205_p1 }
 0x12f   :  { %213 = shalt.err (!%p210_p3)
}
 0x130   :  { %100 = dma.vmem_to_hbm [thread:$0]  %s98_s11, 16, %s298_s3, [#allocation9]  }
 0x131   :  { %218 = dma.done.wait [#allocation4], 16  }
 0x132   :  { %219 = vsyncadd [#allocation4], 4294967280 }
 0x133   :  { %220 = dma.done.wait [#allocation9], 16  }
 0x134   :  { %221 = vsyncadd [#allocation9], 4294967280 }
 0x135   :  { %107 = vsyncpa [#allocation3], 1 }
 0x136   :  { %108 = vsyncpa [#allocation6], 1 }
 0x137   :  { %109 = vsyncpa [#allocation4], 1 }
 0x138   :  { %110 = vsyncpa [#allocation9], 1 }

</bundles_post_ra>
